<compile_context>
chip_gen: v6e
topology: v6e:2x2x1
jax: 0.10.0
libtpu: 0.0.40
codegen_flags: <defaults>
</compile_context>

<pallas_src>
import jax
import jax.numpy as jnp
from jax.experimental import pallas as pl
from jax.experimental.pallas import tpu as pltpu

IN_FEATURES = 512
OUT_FEATURES = 1000
TM_MAX = 1024


def _cdiv(a, b):
    return (a + b - 1) // b


def _round_up(x, m):
    return _cdiv(x, m) * m


def fc_kernel(x_ref, w_ref, b_ref, o_ref):
    # bf16 operands on the MXU, f32 accumulation, f32 bias add on the VPU.
    x_bf = x_ref[...].astype(jnp.bfloat16)
    acc = jnp.dot(x_bf, w_ref[...], preferred_element_type=jnp.float32)
    o_ref[...] = (acc + b_ref[...]).astype(o_ref.dtype)


def prepare_params(weight, bias):
    """One-time (init-time) parameter prep, not in the hot path.

    weight: (1000, 512) f32 -> w_t: (512, 1000) bf16 (native MXU dtype,
    half the weight DMA); bias: (1000,) -> (1, 1000) f32 so the bias add
    stays in f32.
    """
    w_t = jnp.asarray(weight).T.astype(jnp.bfloat16)
    b2d = jnp.asarray(bias).reshape(1, OUT_FEATURES).astype(jnp.float32)
    return w_t, b2d


def fully_connected(x, w_t, b2d, *, tm_max=TM_MAX):
    """x: (N, 512) f32; w_t: (512, 1000) bf16; b2d: (1, 1000) f32 -> (N, 1000) f32."""
    n = x.shape[0]

    # Tiny batches only: pad rows up to one sublane group (8 rows, ~16 KB).
    n_eff = n
    if n < 8:
        x = jnp.pad(x, ((0, 8 - n), (0, 0)))
        n_eff = 8

    # Row-tile selection:
    #  * multiple of 8 (sublane aligned), never larger than the array,
    #  * as large as possible (bigger DMAs, less per-step overhead),
    #  * >= 2 tiles when the batch is big enough (dual TensorCore on v7x),
    #  * minimal waste in the (possibly partial) last tile, so no jnp.pad of x
    #    and no output row-slice is needed for n >= 8.
    tm_cap = min(tm_max, (n_eff // 8) * 8)
    n_tiles = _cdiv(n_eff, tm_cap)
    if n_tiles == 1 and n_eff > 16:
        n_tiles = 2
    tm = min(tm_cap, _round_up(_cdiv(n_eff, n_tiles), 8))
    grid = (_cdiv(n_eff, tm),)

    cost = pl.CostEstimate(
        flops=2 * n_eff * IN_FEATURES * OUT_FEATURES,
        transcendentals=0,
        bytes_accessed=(4 * n_eff * IN_FEATURES            # x (f32)
                        + 2 * IN_FEATURES * OUT_FEATURES   # weight (bf16)
                        + 4 * OUT_FEATURES                  # bias (f32)
                        + 4 * n_eff * OUT_FEATURES),        # out (f32)
    )

    out = pl.pallas_call(
        fc_kernel,
        out_shape=jax.ShapeDtypeStruct((n_eff, OUT_FEATURES), x.dtype),
        grid_spec=pltpu.PrefetchScalarGridSpec(
            num_scalar_prefetch=0,
            grid=grid,
            in_specs=[
                # x tile marches down the batch axis (double-buffered by Pallas).
                pl.BlockSpec((tm, IN_FEATURES), lambda i: (i, 0)),
                # Weight / bias: constant block index -> DMA'd once and kept
                # VMEM-resident across the whole grid.
                pl.BlockSpec((IN_FEATURES, OUT_FEATURES), lambda i: (0, 0)),
                pl.BlockSpec((1, OUT_FEATURES), lambda i: (0, 0)),
            ],
            # Last dim == full array extent (1000): legal BlockSpec; only the
            # final 104-lane group takes a masked store.  Avoids any
            # post-kernel column-slice pass over HBM.
            out_specs=pl.BlockSpec((tm, OUT_FEATURES), lambda i: (i, 0)),
        ),
        compiler_params=pltpu.CompilerParams(
            # Independent N tiles: shard across cores (2 TCs on v7x).
            dimension_semantics=("parallel",),
            # ~14-15 MiB peak at tm=1024 (f32 x/out double-buffered + bf16 w);
            # raise above v5e's 16 MiB scoped default, still fine on v7x.
            vmem_limit_bytes=32 * 1024 * 1024,
        ),
        cost_estimate=cost,
    )(x, w_t, b2d)

    # Only tiny batches (n < 8) ever need a (cheap) row un-pad.
    return out[:n] if n_eff != n else out


if __name__ == "__main__":
    key = jax.random.PRNGKey(0)
    kx, kw, kb = jax.random.split(key, 3)

    batch = 2
    # Deterministic synthetic parameters (PyTorch-like uniform init scale).
    bound = 1.0 / (IN_FEATURES ** 0.5)
    x = jax.random.normal(kx, (batch, IN_FEATURES), dtype=jnp.float32)
    weight = jax.random.uniform(kw, (OUT_FEATURES, IN_FEATURES),
                                minval=-bound, maxval=bound, dtype=jnp.float32)
    bias = jax.random.uniform(kb, (OUT_FEATURES,),
                              minval=-bound, maxval=bound, dtype=jnp.float32)

    # One-time parameter prep (transpose + bf16 cast), then the hot-path call.
    w_t, b2d = prepare_params(weight, bias)
    out = jax.block_until_ready(fully_connected(x, w_t, b2d))

    # Reference check against plain JAX (same math as torch.nn.Linear).
    ref = x @ weight.T + bias
    assert out.shape == (batch, OUT_FEATURES), out.shape
    # bf16 operands / f32 accumulation: ~1e-2-scale agreement vs the f32 ref.
    assert jnp.allclose(out, ref, atol=2e-2, rtol=2e-2), \
        float(jnp.max(jnp.abs(out - ref)))

    print("KERNEL_OK")
</pallas_src>

<mosaic_0001>
module attributes {stable_mosaic.version = 11 : i64} {
  func.func @fc_kernel(%arg0: i32, %arg1: memref<8x512xf32, #tpu.memory_space<vmem>>, %arg2: memref<512x1000xbf16, #tpu.memory_space<vmem>>, %arg3: memref<1x1000xf32, #tpu.memory_space<vmem>>, %arg4: memref<8x1000xf32, #tpu.memory_space<vmem>>) attributes {dimension_semantics = [#tpu.dimension_semantics<parallel>], iteration_bounds = array<i64: 1>, scalar_prefetch = 0 : i64, scratch_operands = 0 : i64, tpu.core_type = #tpu.core_type<tc>, window_params = [{transform_indices = @transform_0, window_bounds = array<i64: 8, 512>}, {pipeline_mode = #tpu.pipeline_mode<synchronous>, transform_indices = @transform_1, window_bounds = array<i64: 512, 1000>}, {pipeline_mode = #tpu.pipeline_mode<synchronous>, transform_indices = @transform_2, window_bounds = array<i64: 1, 1000>}, {transform_indices = @transform_3, window_bounds = array<i64: 8, 1000>}]} {
    %c0 = arith.constant 0 : index
    %c0_0 = arith.constant 0 : index
    %0 = vector.load %arg1[%c0, %c0_0] : memref<8x512xf32, #tpu.memory_space<vmem>>, vector<8x512xf32>
    %1 = arith.truncf %0 : vector<8x512xf32> to vector<8x512xbf16>
    %c0_1 = arith.constant 0 : index
    %c0_2 = arith.constant 0 : index
    %2 = vector.load %arg2[%c0_1, %c0_2] : memref<512x1000xbf16, #tpu.memory_space<vmem>>, vector<512x1000xbf16>
    %cst = arith.constant dense<0.000000e+00> : vector<8x1000xf32>
    %3 = tpu.matmul %1, %2, %cst {dimension_numbers = #tpu.dot_dimension_numbers<[1], [0], [0], [1], [0, 0, 1, 1], [], []>} : vector<8x512xbf16>, vector<512x1000xbf16>, vector<8x1000xf32> -> vector<8x1000xf32>
    %c0_3 = arith.constant 0 : index
    %c0_4 = arith.constant 0 : index
    %4 = vector.load %arg3[%c0_3, %c0_4] : memref<1x1000xf32, #tpu.memory_space<vmem>>, vector<1x1000xf32>
    %5 = vector.broadcast %4 : vector<1x1000xf32> to vector<8x1000xf32>
    %6 = arith.addf %3, %5 : vector<8x1000xf32>
    %c0_5 = arith.constant 0 : index
    %c0_6 = arith.constant 0 : index
    %7 = vector.load %arg4[%c0_5, %c0_6] : memref<8x1000xf32, #tpu.memory_space<vmem>>, vector<8x1000xf32>
    tpu.vector_store %arg4[%c0_5, %c0_6], %6 {strides = array<i32>} : memref<8x1000xf32, #tpu.memory_space<vmem>>, vector<8x1000xf32>,
    return
  }
  func.func @transform_0(%arg0: i32) -> (i32, i32) {
    %c0_i32 = arith.constant 0 : i32
    %c0_i32_0 = arith.constant 0 : i32
    return %arg0, %c0_i32 : i32, i32
  }
  func.func @transform_1(%arg0: i32) -> (i32, i32) {
    %c0_i32 = arith.constant 0 : i32
    %c0_i32_0 = arith.constant 0 : i32
    %c0_i32_1 = arith.constant 0 : i32
    return %c0_i32, %c0_i32_0 : i32, i32
  }
  func.func @transform_2(%arg0: i32) -> (i32, i32) {
    %c0_i32 = arith.constant 0 : i32
    %c0_i32_0 = arith.constant 0 : i32
    %c0_i32_1 = arith.constant 0 : i32
    return %c0_i32, %c0_i32_0 : i32, i32
  }
  func.func @transform_3(%arg0: i32) -> (i32, i32) {
    %c0_i32 = arith.constant 0 : i32
    %c0_i32_0 = arith.constant 0 : i32
    return %arg0, %c0_i32 : i32, i32
  }
}

</mosaic_0001>

<bundles_post_ra>
// kernel: tpu_custom_call.1
= control target key start
LH: loop header
LB: loop body
LE: loop exit
PB: predicated region body
PF: predicated region fallthrough
CT: control target
= control target key end

     0   :  { %s3072_s0 = inlined_call_operand.vmem [shape: f32[8,512], index: 0, kind: input, shape index: {}]   ;;  %s3073_s1 = inlined_call_operand.vmem [shape: bf16[512,1000], index: 1, kind: input, shape index: {}]   ;;  %s3074_s2 = inlined_call_operand.vmem [shape: f32[1,1000], index: 2, kind: input, shape index: {}]   ;;  %s3075_s3 = inlined_call_operand.hbm [shape: f32[8,1000], index: 3, kind: output, shape index: {}]  }
   0x1   :  { %v79_v0 = vld [vmem:[%s3073_s1 + $0x1c0] sm:$0xff]  ;;  %v16_v53 = vld [vmem:[%s3072_s0 + $0x8] sm:$0xff]  ;;  %v18_v54 = vld [vmem:[%s3072_s0 + $0x18] sm:$0xff] }
   0x2   :  { %v83_v1 = vld [vmem:[%s3073_s1 + $0x1e0] sm:$0xff]  ;;  %v2348_v58 = vpack.c.bf16 %v16_v53, %v16_v53  ;;  %v2350_v59 = vpack.c.bf16 %v18_v54, %v18_v54 }
   0x3   :  { %v207_v2 = vld [vmem:[%s3073_s1 + $0x5c0] sm:$0xff]  ;;  %v2009_v3 = vcombine.high %v79_v0, %v83_v1  ;;  %v2008_v5 = vcombine.low %v79_v0, %v83_v1 }
   0x4   :  { %v211_v4 = vld [vmem:[%s3073_s1 + $0x5e0] sm:$0xff]  ;;  %1633 = vmatprep.mubr.bf16.mxu0 %v2348_v58  ;;  %1674 = vmatprep.mubr.bf16.mxu1 %v2350_v59 }
   0x5   :  { %v71_v6 = vld [vmem:[%s3073_s1 + $0x180] sm:$0xff]  ;;  %v2137_v8 = vcombine.high %v207_v2, %v211_v4  ;;  %v2136_v9 = vcombine.low %v207_v2, %v211_v4  ;;  %1601 = vmatprep.subr.bf16.mxu0 %v2009_v3 }
   0x6   :  { %v75_v7 = vld [vmem:[%s3073_s1 + $0x1a0] sm:$0xff]  ;;  %1602 = vmatpush1.bf16.msra.mxu0 %v2008_v5 }
   0x7   :  { %v2001_v10 = vcombine.high %v71_v6, %v75_v7  ;;  %v199_v11 = vld [vmem:[%s3073_s1 + $0x580] sm:$0xff]  ;;  %1642 = vmatprep.subr.bf16.mxu1 %v2137_v8  ;;  %v2000_v18 = vcombine.low %v71_v6, %v75_v7 }
   0x8   :  { %v203_v12 = vld [vmem:[%s3073_s1 + $0x5a0] sm:$0xff]  ;;  %1643 = vmatpush1.bf16.msra.mxu1 %v2136_v9 }
   0x9   :  { %v63_v13 = vld [vmem:[%s3073_s1 + $0x140] sm:$0xff]  ;;  %v2129_v14 = vcombine.high %v199_v11, %v203_v12  ;;  %1603 = vmatprep.subr.bf16.mxu0 %v2001_v10  ;;  %v2128_v19 = vcombine.low %v199_v11, %v203_v12 }
   0xa   :  { %v67_v15 = vld [vmem:[%s3073_s1 + $0x160] sm:$0xff]  ;;  %1604 = vmatpush1.bf16.msra.mxu0 %v2000_v18 }
   0xb   :  { %v191_v16 = vld [vmem:[%s3073_s1 + $0x540] sm:$0xff]  ;;  %v1993_v20 = vcombine.high %v63_v13, %v67_v15  ;;  %1644 = vmatprep.subr.bf16.mxu1 %v2129_v14  ;;  %v1992_v26 = vcombine.low %v63_v13, %v67_v15 }
   0xc   :  { %v195_v17 = vld [vmem:[%s3073_s1 + $0x560] sm:$0xff]  ;;  %1645 = vmatpush1.bf16.msra.mxu1 %v2128_v19 }
   0xd   :  { %v2121_v21 = vcombine.high %v191_v16, %v195_v17  ;;  %v55_v22 = vld [vmem:[%s3073_s1 + $0x100] sm:$0xff]  ;;  %1605 = vmatprep.subr.bf16.mxu0 %v1993_v20  ;;  %v2120_v27 = vcombine.low %v191_v16, %v195_v17 }
   0xe   :  { %v59_v23 = vld [vmem:[%s3073_s1 + $0x120] sm:$0xff]  ;;  %1606 = vmatpush1.bf16.msra.mxu0 %v1992_v26 }
   0xf   :  { %v183_v24 = vld [vmem:[%s3073_s1 + $0x500] sm:$0xff]  ;;  %v1985_v28 = vcombine.high %v55_v22, %v59_v23  ;;  %1646 = vmatprep.subr.bf16.mxu1 %v2121_v21  ;;  %v1984_v34 = vcombine.low %v55_v22, %v59_v23 }
  0x10   :  { %v187_v25 = vld [vmem:[%s3073_s1 + $0x520] sm:$0xff]  ;;  %1647 = vmatpush1.bf16.msra.mxu1 %v2120_v27 }
  0x11   :  { %v2113_v29 = vcombine.high %v183_v24, %v187_v25  ;;  %v47_v30 = vld [vmem:[%s3073_s1 + $0xc0] sm:$0xff]  ;;  %1607 = vmatprep.subr.bf16.mxu0 %v1985_v28  ;;  %v2112_v35 = vcombine.low %v183_v24, %v187_v25 }
  0x12   :  { %v51_v31 = vld [vmem:[%s3073_s1 + $0xe0] sm:$0xff]  ;;  %1608 = vmatpush1.bf16.msra.mxu0 %v1984_v34 }
  0x13   :  { %v175_v32 = vld [vmem:[%s3073_s1 + $0x4c0] sm:$0xff]  ;;  %v1977_v36 = vcombine.high %v47_v30, %v51_v31  ;;  %1648 = vmatprep.subr.bf16.mxu1 %v2113_v29  ;;  %v1976_v42 = vcombine.low %v47_v30, %v51_v31 }
  0x14   :  { %v179_v33 = vld [vmem:[%s3073_s1 + $0x4e0] sm:$0xff]  ;;  %1649 = vmatpush1.bf16.msra.mxu1 %v2112_v35 }
  0x15   :  { %v2105_v37 = vcombine.high %v175_v32, %v179_v33  ;;  %v39_v38 = vld [vmem:[%s3073_s1 + $0x80] sm:$0xff]  ;;  %1609 = vmatprep.subr.bf16.mxu0 %v1977_v36  ;;  %v2104_v43 = vcombine.low %v175_v32, %v179_v33 }
  0x16   :  { %v43_v39 = vld [vmem:[%s3073_s1 + $0xa0] sm:$0xff]  ;;  %1610 = vmatpush1.bf16.msra.mxu0 %v1976_v42 }
  0x17   :  { %v167_v40 = vld [vmem:[%s3073_s1 + $0x480] sm:$0xff]  ;;  %v1969_v44 = vcombine.high %v39_v38, %v43_v39  ;;  %1650 = vmatprep.subr.bf16.mxu1 %v2105_v37  ;;  %v1968_v50 = vcombine.low %v39_v38, %v43_v39 }
  0x18   :  { %v171_v41 = vld [vmem:[%s3073_s1 + $0x4a0] sm:$0xff]  ;;  %1651 = vmatpush1.bf16.msra.mxu1 %v2104_v43 }
  0x19   :  { %v2097_v45 = vcombine.high %v167_v40, %v171_v41  ;;  %v31_v46 = vld [vmem:[%s3073_s1 + $0x40] sm:$0xff]  ;;  %1611 = vmatprep.subr.bf16.mxu0 %v1969_v44  ;;  %v2096_v51 = vcombine.low %v167_v40, %v171_v41 }
  0x1a   :  { %v35_v47 = vld [vmem:[%s3073_s1 + $0x60] sm:$0xff]  ;;  %1612 = vmatpush1.bf16.msra.mxu0 %v1968_v50 }
  0x1b   :  { %v159_v48 = vld [vmem:[%s3073_s1 + $0x440] sm:$0xff]  ;;  %v1961_v52 = vcombine.high %v31_v46, %v35_v47  ;;  %1652 = vmatprep.subr.bf16.mxu1 %v2097_v45  ;;  %v1960_v62 = vcombine.low %v31_v46, %v35_v47 }
  0x1c   :  { %v163_v49 = vld [vmem:[%s3073_s1 + $0x460] sm:$0xff]  ;;  %1653 = vmatpush1.bf16.msra.mxu1 %v2096_v51 }
  0x1d   :  { %v2089_v55 = vcombine.high %v159_v48, %v163_v49  ;;  %v23_v56 = vld [vmem:[%s3073_s1] sm:$0xff]  ;;  %1613 = vmatprep.subr.bf16.mxu0 %v1961_v52  ;;  %v2088_v63 = vcombine.low %v159_v48, %v163_v49 }
  0x1e   :  { %v27_v57 = vld [vmem:[%s3073_s1 + $0x20] sm:$0xff]  ;;  %1614 = vmatpush1.bf16.msra.mxu0 %v1960_v62 }
  0x1f   :  { %v151_v60 = vld [vmem:[%s3073_s1 + $0x400] sm:$0xff]  ;;  %v1953_v0 = vcombine.high %v23_v56, %v27_v57  ;;  %1654 = vmatprep.subr.bf16.mxu1 %v2089_v55  ;;  %v1952_v6 = vcombine.low %v23_v56, %v27_v57 }
  0x20   :  { %v155_v61 = vld [vmem:[%s3073_s1 + $0x420] sm:$0xff]  ;;  %1655 = vmatpush1.bf16.msra.mxu1 %v2088_v63 }
  0x21   :  { %v2081_v1 = vcombine.high %v151_v60, %v155_v61  ;;  %v143_v2 = vld [vmem:[%s3073_s1 + $0x3c0] sm:$0xff]  ;;  %1615 = vmatprep.subr.bf16.mxu0 %v1953_v0  ;;  %v2080_v7 = vcombine.low %v151_v60, %v155_v61 }
  0x22   :  { %v147_v3 = vld [vmem:[%s3073_s1 + $0x3e0] sm:$0xff]  ;;  %1616 = vmatpush1.bf16.msra.mxu0 %v1952_v6  ;;  %v208_v6 = vld [vmem:[%s3073_s1 + $0x5c8] sm:$0xff] }
  0x23   :  { %v271_v4 = vld [vmem:[%s3073_s1 + $0x7c0] sm:$0xff]  ;;  %v2073_v8 = vcombine.high %v143_v2, %v147_v3  ;;  %1656 = vmatprep.subr.bf16.mxu1 %v2081_v1  ;;  %v2072_v14 = vcombine.low %v143_v2, %v147_v3 }
  0x24   :  { %v275_v5 = vld [vmem:[%s3073_s1 + $0x7e0] sm:$0xff]  ;;  %1657 = vmatpush1.bf16.msra.mxu1 %v2080_v7  ;;  %v212_v7 = vld [vmem:[%s3073_s1 + $0x5e8] sm:$0xff] }
  0x25   :  { %v2201_v9 = vcombine.high %v271_v4, %v275_v5  ;;  %v135_v10 = vld [vmem:[%s3073_s1 + $0x380] sm:$0xff]  ;;  %1617 = vmatprep.subr.bf16.mxu0 %v2073_v8  ;;  %v2200_v15 = vcombine.low %v271_v4, %v275_v5  ;;  %v80_v4 = vld [vmem:[%s3073_s1 + $0x1c8] sm:$0xff] }
  0x26   :  { %v139_v11 = vld [vmem:[%s3073_s1 + $0x3a0] sm:$0xff]  ;;  %1618 = vmatpush2.bf16.msra.mxu0 %v2072_v14  ;;  %v84_v5 = vld [vmem:[%s3073_s1 + $0x1e8] sm:$0xff] }
  0x27   :  { %v263_v12 = vld [vmem:[%s3073_s1 + $0x780] sm:$0xff]  ;;  %v2065_v16 = vcombine.high %v135_v10, %v139_v11  ;;  %1658 = vmatprep.subr.bf16.mxu1 %v2201_v9  ;;  %v2064_v22 = vcombine.low %v135_v10, %v139_v11  ;;  %v17_v11 = vld [vmem:[%s3072_s0 + $0x10] sm:$0xff]  ;;  %v72_v14 = vld [vmem:[%s3073_s1 + $0x188] sm:$0xff] }
  0x28   :  { %v267_v13 = vld [vmem:[%s3073_s1 + $0x7a0] sm:$0xff]  ;;  %1659 = vmatpush2.bf16.msra.mxu1 %v2200_v15  ;;  %v76_v15 = vld [vmem:[%s3073_s1 + $0x1a8] sm:$0xff] }
  0x29   :  { %v2193_v17 = vcombine.high %v263_v12, %v267_v13  ;;  %v127_v18 = vld [vmem:[%s3073_s1 + $0x340] sm:$0xff]  ;;  %1619 = vmatprep.subr.bf16.mxu0 %v2065_v16  ;;  %v2192_v23 = vcombine.low %v263_v12, %v267_v13  ;;  %v2011_v12 = vcombine.high %v80_v4, %v84_v5  ;;  %v2139_v13 = vcombine.high %v208_v6, %v212_v7 }
  0x2a   :  { %v131_v19 = vld [vmem:[%s3073_s1 + $0x360] sm:$0xff]  ;;  %1620 = vmatpush2.bf16.msra.mxu0 %v2064_v22  ;;  %v2003_v22 = vcombine.high %v72_v14, %v76_v15 }
  0x2b   :  { %v255_v20 = vld [vmem:[%s3073_s1 + $0x740] sm:$0xff]  ;;  %v2057_v24 = vcombine.high %v127_v18, %v131_v19  ;;  %1660 = vmatprep.subr.bf16.mxu1 %v2193_v17  ;;  %v2056_v30 = vcombine.low %v127_v18, %v131_v19  ;;  %v200_v17 = vld [vmem:[%s3073_s1 + $0x588] sm:$0xff]  ;;  %v2488_v19 = vpack.c.bf16 %v17_v11, %v17_v11 }
  0x2c   :  { %v259_v21 = vld [vmem:[%s3073_s1 + $0x760] sm:$0xff]  ;;  %1661 = vmatpush2.bf16.msra.mxu1 %v2192_v23  ;;  %v204_v18 = vld [vmem:[%s3073_s1 + $0x5a8] sm:$0xff] }
  0x2d   :  { %v2185_v25 = vcombine.high %v255_v20, %v259_v21  ;;  %v119_v26 = vld [vmem:[%s3073_s1 + $0x300] sm:$0xff]  ;;  %1621 = vmatprep.subr.bf16.mxu0 %v2057_v24  ;;  %v2184_v31 = vcombine.low %v255_v20, %v259_v21  ;;  %v2010_v20 = vcombine.low %v80_v4, %v84_v5  ;;  %v2138_v21 = vcombine.low %v208_v6, %v212_v7  ;;  %v64_v24 = vld [vmem:[%s3073_s1 + $0x148] sm:$0xff] }
  0x2e   :  { %v123_v27 = vld [vmem:[%s3073_s1 + $0x320] sm:$0xff]  ;;  %1622 = vmatpush2.bf16.msra.mxu0 %v2056_v30  ;;  %v2131_v23 = vcombine.high %v200_v17, %v204_v18 }
  0x2f   :  { %v247_v28 = vld [vmem:[%s3073_s1 + $0x700] sm:$0xff]  ;;  %v2049_v32 = vcombine.high %v119_v26, %v123_v27  ;;  %1662 = vmatprep.subr.bf16.mxu1 %v2185_v25  ;;  %v2048_v38 = vcombine.low %v119_v26, %v123_v27  ;;  %v68_v25 = vld [vmem:[%s3073_s1 + $0x168] sm:$0xff] }
  0x30   :  { %v251_v29 = vld [vmem:[%s3073_s1 + $0x720] sm:$0xff]  ;;  %1663 = vmatpush2.bf16.msra.mxu1 %v2184_v31 }
  0x31   :  { %v2177_v33 = vcombine.high %v247_v28, %v251_v29  ;;  %v111_v34 = vld [vmem:[%s3073_s1 + $0x2c0] sm:$0xff]  ;;  %1623 = vmatprep.subr.bf16.mxu0 %v2049_v32  ;;  %v2176_v39 = vcombine.low %v247_v28, %v251_v29 }
  0x32   :  { %v115_v35 = vld [vmem:[%s3073_s1 + $0x2e0] sm:$0xff]  ;;  %1624 = vmatpush2.bf16.msra.mxu0 %v2048_v38 }
  0x33   :  { %v239_v36 = vld [vmem:[%s3073_s1 + $0x6c0] sm:$0xff]  ;;  %v2041_v40 = vcombine.high %v111_v34, %v115_v35  ;;  %1664 = vmatprep.subr.bf16.mxu1 %v2177_v33  ;;  %v2040_v46 = vcombine.low %v111_v34, %v115_v35 }
  0x34   :  { %v243_v37 = vld [vmem:[%s3073_s1 + $0x6e0] sm:$0xff]  ;;  %1665 = vmatpush2.bf16.msra.mxu1 %v2176_v39 }
  0x35   :  { %v2169_v41 = vcombine.high %v239_v36, %v243_v37  ;;  %v103_v42 = vld [vmem:[%s3073_s1 + $0x280] sm:$0xff]  ;;  %1625 = vmatprep.subr.bf16.mxu0 %v2041_v40  ;;  %v2168_v47 = vcombine.low %v239_v36, %v243_v37 }
  0x36   :  { %v107_v43 = vld [vmem:[%s3073_s1 + $0x2a0] sm:$0xff]  ;;  %1626 = vmatpush2.bf16.msra.mxu0 %v2040_v46 }
  0x37   :  { %v231_v44 = vld [vmem:[%s3073_s1 + $0x680] sm:$0xff]  ;;  %v2033_v48 = vcombine.high %v103_v42, %v107_v43  ;;  %1666 = vmatprep.subr.bf16.mxu1 %v2169_v41  ;;  %v2032_v54 = vcombine.low %v103_v42, %v107_v43 }
  0x38   :  { %v235_v45 = vld [vmem:[%s3073_s1 + $0x6a0] sm:$0xff]  ;;  %1667 = vmatpush2.bf16.msra.mxu1 %v2168_v47 }
  0x39   :  { %v2161_v49 = vcombine.high %v231_v44, %v235_v45  ;;  %v95_v50 = vld [vmem:[%s3073_s1 + $0x240] sm:$0xff]  ;;  %1627 = vmatprep.subr.bf16.mxu0 %v2033_v48  ;;  %v2160_v55 = vcombine.low %v231_v44, %v235_v45 }
  0x3a   :  { %v99_v51 = vld [vmem:[%s3073_s1 + $0x260] sm:$0xff]  ;;  %1628 = vmatpush2.bf16.msra.mxu0 %v2032_v54 }
  0x3b   :  { %v223_v52 = vld [vmem:[%s3073_s1 + $0x640] sm:$0xff]  ;;  %v2025_v56 = vcombine.high %v95_v50, %v99_v51  ;;  %1668 = vmatprep.subr.bf16.mxu1 %v2161_v49  ;;  %v2024_v0 = vcombine.low %v95_v50, %v99_v51 }
  0x3c   :  { %v227_v53 = vld [vmem:[%s3073_s1 + $0x660] sm:$0xff]  ;;  %1669 = vmatpush2.bf16.msra.mxu1 %v2160_v55 }
  0x3d   :  { %v2153_v57 = vcombine.high %v223_v52, %v227_v53  ;;  %v87_v60 = vld [vmem:[%s3073_s1 + $0x200] sm:$0xff]  ;;  %1629 = vmatprep.subr.bf16.mxu0 %v2025_v56  ;;  %v2152_v1 = vcombine.low %v223_v52, %v227_v53 }
  0x3e   :  { %v91_v61 = vld [vmem:[%s3073_s1 + $0x220] sm:$0xff]  ;;  %1630 = vmatpush2.bf16.msra.mxu0 %v2024_v0 }
  0x3f   :  { %v215_v62 = vld [vmem:[%s3073_s1 + $0x600] sm:$0xff]  ;;  %v2017_v2 = vcombine.high %v87_v60, %v91_v61  ;;  %1670 = vmatprep.subr.bf16.mxu1 %v2153_v57  ;;  %v2016_v8 = vcombine.low %v87_v60, %v91_v61 }
  0x40   :  { %v219_v63 = vld [vmem:[%s3073_s1 + $0x620] sm:$0xff]  ;;  %1671 = vmatpush2.bf16.msra.mxu1 %v2152_v1 }
  0x41   :  { %v2145_v3 = vcombine.high %v215_v62, %v219_v63  ;;  %v15_v9 = vld [vmem:[%s3072_s0] sm:$0xff]  ;;  %1631 = vmatprep.subr.bf16.mxu0 %v2017_v2  ;;  %v2144_v10 = vcombine.low %v215_v62, %v219_v63 }
  0x42   :  { %v2480_v16 = vpack.c.bf16 %v15_v9, %v15_v9  ;;  %1632 = vmatpush2.bf16.msra.mxu0 %v2016_v8 }
  0x43   :  { %1672 = vmatprep.subr.bf16.mxu1 %v2145_v3  ;;  %1683 = vmatprep.subr.bf16.mxu0 %v2011_v12 }
  0x44   :  { %1673 = vmatpush2.bf16.msra.mxu1 %v2144_v10 }
  0x45   :  { %1724 = vmatprep.subr.bf16.mxu1 %v2139_v13 }
  0x46   :  { %8 = vsyncpa [#allocation3], 0  ;;  %1634 = vmatmul.mubr.bf16.vlgmr.msra.gmra.mxu0 %v2480_v16  ;;  %v192_v26 = vld [vmem:[%s3073_s1 + $0x548] sm:$0xff]  ;;  %v2002_v28 = vcombine.low %v72_v14, %v76_v15  ;;  %v2130_v29 = vcombine.low %v200_v17, %v204_v18  ;;  %v1995_v30 = vcombine.high %v64_v24, %v68_v25  ;;  %v1994_v36 = vcombine.low %v64_v24, %v68_v25 }
  0x47   :  { %v196_v27 = vld [vmem:[%s3073_s1 + $0x568] sm:$0xff]  ;;  %1675 = vmatmul.mubr.bf16.vlgmr.msra.gmra.mxu1 %v2488_v19  ;;  %1684 = vmatpush1.bf16.msra.mxu0 %v2010_v20  ;;  %vm1936_vm0 = vcmask 850944  }
  0x48   :  { %1725 = vmatpush1.bf16.msra.mxu1 %v2138_v21  ;;  %1685 = vmatprep.subr.bf16.mxu0 %v2003_v22  ;;  %v2123_v31 = vcombine.high %v192_v26, %v196_v27  ;;  %v56_v32 = vld [vmem:[%s3073_s1 + $0x108] sm:$0xff]  ;;  %v2122_v37 = vcombine.low %v192_v26, %v196_v27 }
  0x49   :  { %1726 = vmatprep.subr.bf16.mxu1 %v2131_v23  ;;  %v60_v33 = vld [vmem:[%s3073_s1 + $0x128] sm:$0xff]  ;;  %1715 = vmatprep.mubr.bf16.mxu0 %v2348_v58 }
  0x4a   :  { %v184_v34 = vld [vmem:[%s3073_s1 + $0x508] sm:$0xff]  ;;  %1756 = vmatprep.mubr.bf16.mxu1 %v2350_v59  ;;  %v1987_v38 = vcombine.high %v56_v32, %v60_v33  ;;  %v1986_v44 = vcombine.low %v56_v32, %v60_v33 }
  0x4b   :  { %v188_v35 = vld [vmem:[%s3073_s1 + $0x528] sm:$0xff]  ;;  %1686 = vmatpush1.bf16.msra.mxu0 %v2002_v28 }
  0x4c   :  { %1727 = vmatpush1.bf16.msra.mxu1 %v2130_v29  ;;  %1687 = vmatprep.subr.bf16.mxu0 %v1995_v30  ;;  %v2115_v39 = vcombine.high %v184_v34, %v188_v35  ;;  %v48_v40 = vld [vmem:[%s3073_s1 + $0xc8] sm:$0xff]  ;;  %v2114_v45 = vcombine.low %v184_v34, %v188_v35 }
  0x4d   :  { %1728 = vmatprep.subr.bf16.mxu1 %v2123_v31  ;;  %v52_v41 = vld [vmem:[%s3073_s1 + $0xe8] sm:$0xff] }
  0x4e   :  { %v176_v42 = vld [vmem:[%s3073_s1 + $0x4c8] sm:$0xff]  ;;  %v1979_v46 = vcombine.high %v48_v40, %v52_v41  ;;  %v1978_v52 = vcombine.low %v48_v40, %v52_v41 }
  0x4f   :  { %v180_v43 = vld [vmem:[%s3073_s1 + $0x4e8] sm:$0xff]  ;;  %1688 = vmatpush1.bf16.msra.mxu0 %v1994_v36 }
  0x50   :  { %1729 = vmatpush1.bf16.msra.mxu1 %v2122_v37  ;;  %1689 = vmatprep.subr.bf16.mxu0 %v1987_v38  ;;  %v2107_v47 = vcombine.high %v176_v42, %v180_v43  ;;  %v40_v48 = vld [vmem:[%s3073_s1 + $0x88] sm:$0xff]  ;;  %v2106_v53 = vcombine.low %v176_v42, %v180_v43 }
  0x51   :  { %1730 = vmatprep.subr.bf16.mxu1 %v2115_v39  ;;  %v44_v49 = vld [vmem:[%s3073_s1 + $0xa8] sm:$0xff] }
  0x52   :  { %v168_v50 = vld [vmem:[%s3073_s1 + $0x488] sm:$0xff]  ;;  %v1971_v54 = vcombine.high %v40_v48, %v44_v49  ;;  %v1970_v62 = vcombine.low %v40_v48, %v44_v49 }
  0x53   :  { %v172_v51 = vld [vmem:[%s3073_s1 + $0x4a8] sm:$0xff]  ;;  %1690 = vmatpush1.bf16.msra.mxu0 %v1986_v44 }
  0x54   :  { %1731 = vmatpush1.bf16.msra.mxu1 %v2114_v45  ;;  %1691 = vmatprep.subr.bf16.mxu0 %v1979_v46  ;;  %v2099_v55 = vcombine.high %v168_v50, %v172_v51  ;;  %v32_v56 = vld [vmem:[%s3073_s1 + $0x48] sm:$0xff]  ;;  %v2098_v63 = vcombine.low %v168_v50, %v172_v51 }
  0x55   :  { %1732 = vmatprep.subr.bf16.mxu1 %v2107_v47  ;;  %v36_v57 = vld [vmem:[%s3073_s1 + $0x68] sm:$0xff] }
  0x56   :  { %v160_v60 = vld [vmem:[%s3073_s1 + $0x448] sm:$0xff]  ;;  %v1963_v0 = vcombine.high %v32_v56, %v36_v57  ;;  %v1962_v6 = vcombine.low %v32_v56, %v36_v57 }
  0x57   :  { %v164_v61 = vld [vmem:[%s3073_s1 + $0x468] sm:$0xff]  ;;  %1692 = vmatpush1.bf16.msra.mxu0 %v1978_v52 }
  0x58   :  { %1733 = vmatpush1.bf16.msra.mxu1 %v2106_v53  ;;  %1693 = vmatprep.subr.bf16.mxu0 %v1971_v54  ;;  %v2091_v1 = vcombine.high %v160_v60, %v164_v61  ;;  %v24_v2 = vld [vmem:[%s3073_s1 + $0x8] sm:$0xff]  ;;  %v2090_v7 = vcombine.low %v160_v60, %v164_v61 }
  0x59   :  { %1734 = vmatprep.subr.bf16.mxu1 %v2099_v55  ;;  %v28_v3 = vld [vmem:[%s3073_s1 + $0x28] sm:$0xff] }
  0x5a   :  { %v152_v4 = vld [vmem:[%s3073_s1 + $0x408] sm:$0xff]  ;;  %v1955_v8 = vcombine.high %v24_v2, %v28_v3  ;;  %v1954_v14 = vcombine.low %v24_v2, %v28_v3 }
  0x5b   :  { %v156_v5 = vld [vmem:[%s3073_s1 + $0x428] sm:$0xff]  ;;  %1694 = vmatpush1.bf16.msra.mxu0 %v1970_v62 }
  0x5c   :  { %1735 = vmatpush1.bf16.msra.mxu1 %v2098_v63  ;;  %1695 = vmatprep.subr.bf16.mxu0 %v1963_v0  ;;  %v2083_v9 = vcombine.high %v152_v4, %v156_v5  ;;  %v144_v10 = vld [vmem:[%s3073_s1 + $0x3c8] sm:$0xff]  ;;  %v2082_v15 = vcombine.low %v152_v4, %v156_v5 }
  0x5d   :  { %1736 = vmatprep.subr.bf16.mxu1 %v2091_v1  ;;  %v148_v11 = vld [vmem:[%s3073_s1 + $0x3e8] sm:$0xff] }
  0x5e   :  { %v272_v12 = vld [vmem:[%s3073_s1 + $0x7c8] sm:$0xff]  ;;  %v2075_v17 = vcombine.high %v144_v10, %v148_v11  ;;  %v2074_v24 = vcombine.low %v144_v10, %v148_v11 }
  0x5f   :  { %v276_v13 = vld [vmem:[%s3073_s1 + $0x7e8] sm:$0xff]  ;;  %1696 = vmatpush1.bf16.msra.mxu0 %v1962_v6 }
  0x60   :  { %1737 = vmatpush1.bf16.msra.mxu1 %v2090_v7  ;;  %1697 = vmatprep.subr.bf16.mxu0 %v1955_v8  ;;  %v2203_v18 = vcombine.high %v272_v12, %v276_v13  ;;  %v136_v20 = vld [vmem:[%s3073_s1 + $0x388] sm:$0xff]  ;;  %v2202_v25 = vcombine.low %v272_v12, %v276_v13 }
  0x61   :  { %1738 = vmatprep.subr.bf16.mxu1 %v2083_v9  ;;  %v140_v21 = vld [vmem:[%s3073_s1 + $0x3a8] sm:$0xff] }
  0x62   :  { %v264_v22 = vld [vmem:[%s3073_s1 + $0x788] sm:$0xff]  ;;  %v2067_v26 = vcombine.high %v136_v20, %v140_v21  ;;  %v2066_v32 = vcombine.low %v136_v20, %v140_v21 }
  0x63   :  { %v268_v23 = vld [vmem:[%s3073_s1 + $0x7a8] sm:$0xff]  ;;  %1698 = vmatpush1.bf16.msra.mxu0 %v1954_v14  ;;  %v81_v14 = vld [vmem:[%s3073_s1 + $0x1d0] sm:$0xff] }
  0x64   :  { %1739 = vmatpush1.bf16.msra.mxu1 %v2082_v15  ;;  %1699 = vmatprep.subr.bf16.mxu0 %v2075_v17  ;;  %v2195_v27 = vcombine.high %v264_v22, %v268_v23  ;;  %v128_v28 = vld [vmem:[%s3073_s1 + $0x348] sm:$0xff]  ;;  %v2194_v33 = vcombine.low %v264_v22, %v268_v23  ;;  %v85_v15 = vld [vmem:[%s3073_s1 + $0x1f0] sm:$0xff] }
  0x65   :  { %1740 = vmatprep.subr.bf16.mxu1 %v2203_v18  ;;  %v132_v29 = vld [vmem:[%s3073_s1 + $0x368] sm:$0xff]  ;;  %v209_v17 = vld [vmem:[%s3073_s1 + $0x5d0] sm:$0xff]  ;;  %v2013_v22 = vcombine.high %v81_v14, %v85_v15 }
  0x66   :  { %v256_v30 = vld [vmem:[%s3073_s1 + $0x748] sm:$0xff]  ;;  %v2059_v34 = vcombine.high %v128_v28, %v132_v29  ;;  %v2058_v40 = vcombine.low %v128_v28, %v132_v29  ;;  %v213_v18 = vld [vmem:[%s3073_s1 + $0x5f0] sm:$0xff]  ;;  %v2012_v28 = vcombine.low %v81_v14, %v85_v15 }
  0x67   :  { %v260_v31 = vld [vmem:[%s3073_s1 + $0x768] sm:$0xff]  ;;  %1700 = vmatpush2.bf16.msra.mxu0 %v2074_v24  ;;  %v2141_v23 = vcombine.high %v209_v17, %v213_v18  ;;  %v73_v24 = vld [vmem:[%s3073_s1 + $0x190] sm:$0xff]  ;;  %v2140_v29 = vcombine.low %v209_v17, %v213_v18 }
  0x68   :  { %1741 = vmatpush2.bf16.msra.mxu1 %v2202_v25  ;;  %1701 = vmatprep.subr.bf16.mxu0 %v2067_v26  ;;  %v2187_v35 = vcombine.high %v256_v30, %v260_v31  ;;  %v120_v36 = vld [vmem:[%s3073_s1 + $0x308] sm:$0xff]  ;;  %v2186_v41 = vcombine.low %v256_v30, %v260_v31  ;;  %v77_v25 = vld [vmem:[%s3073_s1 + $0x1b0] sm:$0xff] }
  0x69   :  { %1742 = vmatprep.subr.bf16.mxu1 %v2195_v27  ;;  %v124_v37 = vld [vmem:[%s3073_s1 + $0x328] sm:$0xff]  ;;  %v201_v26 = vld [vmem:[%s3073_s1 + $0x590] sm:$0xff]  ;;  %v2005_v30 = vcombine.high %v73_v24, %v77_v25 }
  0x6a   :  { %v248_v38 = vld [vmem:[%s3073_s1 + $0x708] sm:$0xff]  ;;  %v2051_v42 = vcombine.high %v120_v36, %v124_v37  ;;  %v2050_v48 = vcombine.low %v120_v36, %v124_v37  ;;  %v205_v27 = vld [vmem:[%s3073_s1 + $0x5b0] sm:$0xff]  ;;  %v2004_v36 = vcombine.low %v73_v24, %v77_v25 }
  0x6b   :  { %v252_v39 = vld [vmem:[%s3073_s1 + $0x728] sm:$0xff]  ;;  %1702 = vmatpush2.bf16.msra.mxu0 %v2066_v32  ;;  %v2133_v31 = vcombine.high %v201_v26, %v205_v27  ;;  %v65_v32 = vld [vmem:[%s3073_s1 + $0x150] sm:$0xff]  ;;  %v2132_v37 = vcombine.low %v201_v26, %v205_v27 }
  0x6c   :  { %1743 = vmatpush2.bf16.msra.mxu1 %v2194_v33  ;;  %1703 = vmatprep.subr.bf16.mxu0 %v2059_v34  ;;  %v2179_v43 = vcombine.high %v248_v38, %v252_v39  ;;  %v112_v44 = vld [vmem:[%s3073_s1 + $0x2c8] sm:$0xff]  ;;  %v2178_v49 = vcombine.low %v248_v38, %v252_v39  ;;  %v69_v33 = vld [vmem:[%s3073_s1 + $0x170] sm:$0xff] }
  0x6d   :  { %1744 = vmatprep.subr.bf16.mxu1 %v2187_v35  ;;  %v116_v45 = vld [vmem:[%s3073_s1 + $0x2e8] sm:$0xff]  ;;  %v193_v34 = vld [vmem:[%s3073_s1 + $0x550] sm:$0xff]  ;;  %v1997_v38 = vcombine.high %v65_v32, %v69_v33 }
  0x6e   :  { %v240_v46 = vld [vmem:[%s3073_s1 + $0x6c8] sm:$0xff]  ;;  %v2043_v50 = vcombine.high %v112_v44, %v116_v45  ;;  %v2042_v56 = vcombine.low %v112_v44, %v116_v45  ;;  %v197_v35 = vld [vmem:[%s3073_s1 + $0x570] sm:$0xff]  ;;  %v1996_v44 = vcombine.low %v65_v32, %v69_v33 }
  0x6f   :  { %v244_v47 = vld [vmem:[%s3073_s1 + $0x6e8] sm:$0xff]  ;;  %1704 = vmatpush2.bf16.msra.mxu0 %v2058_v40  ;;  %v2125_v39 = vcombine.high %v193_v34, %v197_v35  ;;  %v57_v40 = vld [vmem:[%s3073_s1 + $0x110] sm:$0xff]  ;;  %v2124_v45 = vcombine.low %v193_v34, %v197_v35 }
  0x70   :  { %1745 = vmatpush2.bf16.msra.mxu1 %v2186_v41  ;;  %1705 = vmatprep.subr.bf16.mxu0 %v2051_v42  ;;  %v2171_v51 = vcombine.high %v240_v46, %v244_v47  ;;  %v104_v52 = vld [vmem:[%s3073_s1 + $0x288] sm:$0xff]  ;;  %v2170_v57 = vcombine.low %v240_v46, %v244_v47  ;;  %v61_v41 = vld [vmem:[%s3073_s1 + $0x130] sm:$0xff] }
  0x71   :  { %1746 = vmatprep.subr.bf16.mxu1 %v2179_v43  ;;  %v108_v53 = vld [vmem:[%s3073_s1 + $0x2a8] sm:$0xff]  ;;  %v185_v42 = vld [vmem:[%s3073_s1 + $0x510] sm:$0xff]  ;;  %v1989_v46 = vcombine.high %v57_v40, %v61_v41 }
  0x72   :  { %v232_v54 = vld [vmem:[%s3073_s1 + $0x688] sm:$0xff]  ;;  %v2035_v60 = vcombine.high %v104_v52, %v108_v53  ;;  %v2034_v2 = vcombine.low %v104_v52, %v108_v53  ;;  %v189_v43 = vld [vmem:[%s3073_s1 + $0x530] sm:$0xff]  ;;  %v1988_v52 = vcombine.low %v57_v40, %v61_v41 }
  0x73   :  { %v236_v55 = vld [vmem:[%s3073_s1 + $0x6a8] sm:$0xff]  ;;  %1706 = vmatpush2.bf16.msra.mxu0 %v2050_v48  ;;  %v2117_v47 = vcombine.high %v185_v42, %v189_v43  ;;  %v49_v48 = vld [vmem:[%s3073_s1 + $0xd0] sm:$0xff]  ;;  %v2116_v53 = vcombine.low %v185_v42, %v189_v43 }
  0x74   :  { %1747 = vmatpush2.bf16.msra.mxu1 %v2178_v49  ;;  %1707 = vmatprep.subr.bf16.mxu0 %v2043_v50  ;;  %v2163_v61 = vcombine.high %v232_v54, %v236_v55  ;;  %v96_v62 = vld [vmem:[%s3073_s1 + $0x248] sm:$0xff]  ;;  %v2162_v3 = vcombine.low %v232_v54, %v236_v55  ;;  %v53_v49 = vld [vmem:[%s3073_s1 + $0xf0] sm:$0xff] }
  0x75   :  { %1748 = vmatprep.subr.bf16.mxu1 %v2171_v51  ;;  %v100_v63 = vld [vmem:[%s3073_s1 + $0x268] sm:$0xff]  ;;  %v177_v50 = vld [vmem:[%s3073_s1 + $0x4d0] sm:$0xff]  ;;  %v1981_v54 = vcombine.high %v49_v48, %v53_v49 }
  0x76   :  { %v224_v0 = vld [vmem:[%s3073_s1 + $0x648] sm:$0xff]  ;;  %v2027_v4 = vcombine.high %v96_v62, %v100_v63  ;;  %v2026_v10 = vcombine.low %v96_v62, %v100_v63  ;;  %v181_v51 = vld [vmem:[%s3073_s1 + $0x4f0] sm:$0xff]  ;;  %v1980_v62 = vcombine.low %v49_v48, %v53_v49 }
  0x77   :  { %v228_v1 = vld [vmem:[%s3073_s1 + $0x668] sm:$0xff]  ;;  %1708 = vmatpush2.bf16.msra.mxu0 %v2042_v56  ;;  %v2109_v55 = vcombine.high %v177_v50, %v181_v51  ;;  %v41_v56 = vld [vmem:[%s3073_s1 + $0x90] sm:$0xff]  ;;  %v2108_v63 = vcombine.low %v177_v50, %v181_v51 }
  0x78   :  { %1749 = vmatpush2.bf16.msra.mxu1 %v2170_v57  ;;  %1709 = vmatprep.subr.bf16.mxu0 %v2035_v60  ;;  %v2155_v5 = vcombine.high %v224_v0, %v228_v1  ;;  %v88_v6 = vld [vmem:[%s3073_s1 + $0x208] sm:$0xff]  ;;  %v2154_v11 = vcombine.low %v224_v0, %v228_v1  ;;  %v45_v57 = vld [vmem:[%s3073_s1 + $0xb0] sm:$0xff] }
  0x79   :  { %1750 = vmatprep.subr.bf16.mxu1 %v2163_v61  ;;  %v92_v7 = vld [vmem:[%s3073_s1 + $0x228] sm:$0xff]  ;;  %v169_v60 = vld [vmem:[%s3073_s1 + $0x490] sm:$0xff]  ;;  %v1973_v0 = vcombine.high %v41_v56, %v45_v57 }
  0x7a   :  { %v216_v8 = vld [vmem:[%s3073_s1 + $0x608] sm:$0xff]  ;;  %v2019_v12 = vcombine.high %v88_v6, %v92_v7  ;;  %v2018_v20 = vcombine.low %v88_v6, %v92_v7  ;;  %v173_v61 = vld [vmem:[%s3073_s1 + $0x4b0] sm:$0xff]  ;;  %v1972_v6 = vcombine.low %v41_v56, %v45_v57 }
  0x7b   :  { %v220_v9 = vld [vmem:[%s3073_s1 + $0x628] sm:$0xff]  ;;  %1710 = vmatpush2.bf16.msra.mxu0 %v2034_v2  ;;  %v2101_v1 = vcombine.high %v169_v60, %v173_v61  ;;  %v33_v2 = vld [vmem:[%s3073_s1 + $0x50] sm:$0xff]  ;;  %v2100_v7 = vcombine.low %v169_v60, %v173_v61 }
  0x7c   :  { %1751 = vmatpush2.bf16.msra.mxu1 %v2162_v3  ;;  %1711 = vmatprep.subr.bf16.mxu0 %v2027_v4  ;;  %v2147_v13 = vcombine.high %v216_v8, %v220_v9  ;;  %v2146_v21 = vcombine.low %v216_v8, %v220_v9  ;;  %v37_v3 = vld [vmem:[%s3073_s1 + $0x70] sm:$0xff] }
  0x7d   :  { %1752 = vmatprep.subr.bf16.mxu1 %v2155_v5  ;;  %v161_v4 = vld [vmem:[%s3073_s1 + $0x450] sm:$0xff]  ;;  %v1965_v8 = vcombine.high %v33_v2, %v37_v3  ;;  %v1964_v14 = vcombine.low %v33_v2, %v37_v3 }
  0x7e   :  { %v165_v5 = vld [vmem:[%s3073_s1 + $0x470] sm:$0xff] }
  0x7f   :  { %1712 = vmatpush2.bf16.msra.mxu0 %v2026_v10  ;;  %v2093_v9 = vcombine.high %v161_v4, %v165_v5  ;;  %v25_v10 = vld [vmem:[%s3073_s1 + $0x10] sm:$0xff]  ;;  %v2092_v15 = vcombine.low %v161_v4, %v165_v5 }
  0x80   :  { %1753 = vmatpush2.bf16.msra.mxu1 %v2154_v11  ;;  %1713 = vmatprep.subr.bf16.mxu0 %v2019_v12  ;;  %v29_v11 = vld [vmem:[%s3073_s1 + $0x30] sm:$0xff] }
  0x81   :  { %1754 = vmatprep.subr.bf16.mxu1 %v2147_v13  ;;  %v153_v12 = vld [vmem:[%s3073_s1 + $0x410] sm:$0xff]  ;;  %v1957_v17 = vcombine.high %v25_v10, %v29_v11  ;;  %v1956_v24 = vcombine.low %v25_v10, %v29_v11 }
  0x82   :  { %v157_v13 = vld [vmem:[%s3073_s1 + $0x430] sm:$0xff] }
  0x83   :  { %1714 = vmatpush2.bf16.msra.mxu0 %v2018_v20  ;;  %v2085_v18 = vcombine.high %v153_v12, %v157_v13  ;;  %v145_v20 = vld [vmem:[%s3073_s1 + $0x3d0] sm:$0xff]  ;;  %v2084_v25 = vcombine.low %v153_v12, %v157_v13 }
  0x84   :  { %1755 = vmatpush2.bf16.msra.mxu1 %v2146_v21  ;;  %1765 = vmatprep.subr.bf16.mxu0 %v2013_v22  ;;  %v149_v21 = vld [vmem:[%s3073_s1 + $0x3f0] sm:$0xff] }
  0x85   :  { %1806 = vmatprep.subr.bf16.mxu1 %v2141_v23  ;;  %v273_v22 = vld [vmem:[%s3073_s1 + $0x7d0] sm:$0xff]  ;;  %v2077_v26 = vcombine.high %v145_v20, %v149_v21  ;;  %v2076_v32 = vcombine.low %v145_v20, %v149_v21 }
  0x86   :  { %1716 = vmatmul.mubr.bf16.vlgmr.msra.gmra.mxu0 %v2480_v16  ;;  %v277_v23 = vld [vmem:[%s3073_s1 + $0x7f0] sm:$0xff] }
  0x87   :  { %1757 = vmatmul.mubr.bf16.vlgmr.msra.gmra.mxu1 %v2488_v19  ;;  %1766 = vmatpush1.bf16.msra.mxu0 %v2012_v28  ;;  %v2205_v27 = vcombine.high %v273_v22, %v277_v23  ;;  %v137_v28 = vld [vmem:[%s3073_s1 + $0x390] sm:$0xff]  ;;  %v2204_v33 = vcombine.low %v273_v22, %v277_v23 }
  0x88   :  { %1807 = vmatpush1.bf16.msra.mxu1 %v2140_v29  ;;  %1767 = vmatprep.subr.bf16.mxu0 %v2005_v30  ;;  %v141_v29 = vld [vmem:[%s3073_s1 + $0x3b0] sm:$0xff] }
  0x89   :  { %1808 = vmatprep.subr.bf16.mxu1 %v2133_v31  ;;  %1797 = vmatprep.mubr.bf16.mxu0 %v2348_v58  ;;  %v265_v30 = vld [vmem:[%s3073_s1 + $0x790] sm:$0xff]  ;;  %v2069_v34 = vcombine.high %v137_v28, %v141_v29  ;;  %v2068_v40 = vcombine.low %v137_v28, %v141_v29 }
  0x8a   :  { %1838 = vmatprep.mubr.bf16.mxu1 %v2350_v59  ;;  %v269_v31 = vld [vmem:[%s3073_s1 + $0x7b0] sm:$0xff] }
  0x8b   :  { %1768 = vmatpush1.bf16.msra.mxu0 %v2004_v36  ;;  %v2197_v35 = vcombine.high %v265_v30, %v269_v31  ;;  %v129_v36 = vld [vmem:[%s3073_s1 + $0x350] sm:$0xff]  ;;  %v2196_v41 = vcombine.low %v265_v30, %v269_v31 }
  0x8c   :  { %1809 = vmatpush1.bf16.msra.mxu1 %v2132_v37  ;;  %1769 = vmatprep.subr.bf16.mxu0 %v1997_v38  ;;  %v133_v37 = vld [vmem:[%s3073_s1 + $0x370] sm:$0xff] }
  0x8d   :  { %1810 = vmatprep.subr.bf16.mxu1 %v2125_v39  ;;  %v257_v38 = vld [vmem:[%s3073_s1 + $0x750] sm:$0xff]  ;;  %v2061_v42 = vcombine.high %v129_v36, %v133_v37  ;;  %v2060_v48 = vcombine.low %v129_v36, %v133_v37 }
  0x8e   :  { %v261_v39 = vld [vmem:[%s3073_s1 + $0x770] sm:$0xff] }
  0x8f   :  { %1770 = vmatpush1.bf16.msra.mxu0 %v1996_v44  ;;  %v2189_v43 = vcombine.high %v257_v38, %v261_v39  ;;  %v121_v44 = vld [vmem:[%s3073_s1 + $0x310] sm:$0xff]  ;;  %v2188_v49 = vcombine.low %v257_v38, %v261_v39 }
  0x90   :  { %1811 = vmatpush1.bf16.msra.mxu1 %v2124_v45  ;;  %1771 = vmatprep.subr.bf16.mxu0 %v1989_v46  ;;  %v125_v45 = vld [vmem:[%s3073_s1 + $0x330] sm:$0xff] }
  0x91   :  { %1812 = vmatprep.subr.bf16.mxu1 %v2117_v47  ;;  %v249_v46 = vld [vmem:[%s3073_s1 + $0x710] sm:$0xff]  ;;  %v2053_v50 = vcombine.high %v121_v44, %v125_v45  ;;  %v2052_v56 = vcombine.low %v121_v44, %v125_v45 }
  0x92   :  { %v253_v47 = vld [vmem:[%s3073_s1 + $0x730] sm:$0xff] }
  0x93   :  { %1772 = vmatpush1.bf16.msra.mxu0 %v1988_v52  ;;  %v2181_v51 = vcombine.high %v249_v46, %v253_v47  ;;  %v113_v52 = vld [vmem:[%s3073_s1 + $0x2d0] sm:$0xff]  ;;  %v2180_v57 = vcombine.low %v249_v46, %v253_v47 }
  0x94   :  { %1813 = vmatpush1.bf16.msra.mxu1 %v2116_v53  ;;  %1773 = vmatprep.subr.bf16.mxu0 %v1981_v54  ;;  %v117_v53 = vld [vmem:[%s3073_s1 + $0x2f0] sm:$0xff] }
  0x95   :  { %1814 = vmatprep.subr.bf16.mxu1 %v2109_v55  ;;  %v241_v54 = vld [vmem:[%s3073_s1 + $0x6d0] sm:$0xff]  ;;  %v2045_v60 = vcombine.high %v113_v52, %v117_v53  ;;  %v2044_v2 = vcombine.low %v113_v52, %v117_v53 }
  0x96   :  { %v245_v55 = vld [vmem:[%s3073_s1 + $0x6f0] sm:$0xff] }
  0x97   :  { %1774 = vmatpush1.bf16.msra.mxu0 %v1980_v62  ;;  %v2173_v61 = vcombine.high %v241_v54, %v245_v55  ;;  %v105_v62 = vld [vmem:[%s3073_s1 + $0x290] sm:$0xff]  ;;  %v2172_v3 = vcombine.low %v241_v54, %v245_v55 }
  0x98   :  { %1815 = vmatpush1.bf16.msra.mxu1 %v2108_v63  ;;  %1775 = vmatprep.subr.bf16.mxu0 %v1973_v0  ;;  %v109_v63 = vld [vmem:[%s3073_s1 + $0x2b0] sm:$0xff] }
  0x99   :  { %1816 = vmatprep.subr.bf16.mxu1 %v2101_v1  ;;  %v233_v0 = vld [vmem:[%s3073_s1 + $0x690] sm:$0xff]  ;;  %v2037_v4 = vcombine.high %v105_v62, %v109_v63  ;;  %v2036_v10 = vcombine.low %v105_v62, %v109_v63 }
  0x9a   :  { %v237_v1 = vld [vmem:[%s3073_s1 + $0x6b0] sm:$0xff] }
  0x9b   :  { %1776 = vmatpush1.bf16.msra.mxu0 %v1972_v6  ;;  %v2165_v5 = vcombine.high %v233_v0, %v237_v1  ;;  %v97_v6 = vld [vmem:[%s3073_s1 + $0x250] sm:$0xff]  ;;  %v2164_v11 = vcombine.low %v233_v0, %v237_v1  ;;  %v42_v0 = vld [vmem:[%s3073_s1 + $0x98] sm:$0xff] }
  0x9c   :  { %1817 = vmatpush1.bf16.msra.mxu1 %v2100_v7  ;;  %1777 = vmatprep.subr.bf16.mxu0 %v1965_v8  ;;  %v101_v7 = vld [vmem:[%s3073_s1 + $0x270] sm:$0xff]  ;;  %v46_v1 = vld [vmem:[%s3073_s1 + $0xb8] sm:$0xff] }
  0x9d   :  { %1818 = vmatprep.subr.bf16.mxu1 %v2093_v9  ;;  %v225_v8 = vld [vmem:[%s3073_s1 + $0x650] sm:$0xff]  ;;  %v2029_v12 = vcombine.high %v97_v6, %v101_v7  ;;  %v2028_v20 = vcombine.low %v97_v6, %v101_v7  ;;  %v1975_v6 = vcombine.high %v42_v0, %v46_v1 }
  0x9e   :  { %v229_v9 = vld [vmem:[%s3073_s1 + $0x670] sm:$0xff] }
  0x9f   :  { %1778 = vmatpush1.bf16.msra.mxu0 %v1964_v14  ;;  %v2157_v13 = vcombine.high %v225_v8, %v229_v9  ;;  %v89_v14 = vld [vmem:[%s3073_s1 + $0x210] sm:$0xff]  ;;  %v2156_v21 = vcombine.low %v225_v8, %v229_v9  ;;  %v34_v8 = vld [vmem:[%s3073_s1 + $0x58] sm:$0xff] }
  0xa0   :  { %1819 = vmatpush1.bf16.msra.mxu1 %v2092_v15  ;;  %1779 = vmatprep.subr.bf16.mxu0 %v1957_v17  ;;  %v93_v15 = vld [vmem:[%s3073_s1 + $0x230] sm:$0xff]  ;;  %v38_v9 = vld [vmem:[%s3073_s1 + $0x78] sm:$0xff] }
  0xa1   :  { %1820 = vmatprep.subr.bf16.mxu1 %v2085_v18  ;;  %v217_v17 = vld [vmem:[%s3073_s1 + $0x610] sm:$0xff]  ;;  %v2021_v22 = vcombine.high %v89_v14, %v93_v15  ;;  %v2020_v28 = vcombine.low %v89_v14, %v93_v15  ;;  %v1967_v14 = vcombine.high %v34_v8, %v38_v9 }
  0xa2   :  { %v221_v18 = vld [vmem:[%s3073_s1 + $0x630] sm:$0xff] }
  0xa3   :  { %1780 = vmatpush1.bf16.msra.mxu0 %v1956_v24  ;;  %v2149_v23 = vcombine.high %v217_v17, %v221_v18  ;;  %v82_v24 = vld [vmem:[%s3073_s1 + $0x1d8] sm:$0xff]  ;;  %v2148_v29 = vcombine.low %v217_v17, %v221_v18 }
  0xa4   :  { %1821 = vmatpush1.bf16.msra.mxu1 %v2084_v25  ;;  %1781 = vmatprep.subr.bf16.mxu0 %v2077_v26  ;;  %v86_v25 = vld [vmem:[%s3073_s1 + $0x1f8] sm:$0xff] }
  0xa5   :  { %1822 = vmatprep.subr.bf16.mxu1 %v2205_v27  ;;  %v210_v26 = vld [vmem:[%s3073_s1 + $0x5d8] sm:$0xff]  ;;  %v2015_v30 = vcombine.high %v82_v24, %v86_v25  ;;  %v2014_v36 = vcombine.low %v82_v24, %v86_v25 }
  0xa6   :  { %v214_v27 = vld [vmem:[%s3073_s1 + $0x5f8] sm:$0xff] }
  0xa7   :  { %1782 = vmatpush2.bf16.msra.mxu0 %v2076_v32  ;;  %v2143_v31 = vcombine.high %v210_v26, %v214_v27  ;;  %v74_v32 = vld [vmem:[%s3073_s1 + $0x198] sm:$0xff]  ;;  %v2142_v37 = vcombine.low %v210_v26, %v214_v27 }
  0xa8   :  { %1823 = vmatpush2.bf16.msra.mxu1 %v2204_v33  ;;  %1783 = vmatprep.subr.bf16.mxu0 %v2069_v34  ;;  %v78_v33 = vld [vmem:[%s3073_s1 + $0x1b8] sm:$0xff] }
  0xa9   :  { %1824 = vmatprep.subr.bf16.mxu1 %v2197_v35  ;;  %v202_v34 = vld [vmem:[%s3073_s1 + $0x598] sm:$0xff]  ;;  %v2007_v38 = vcombine.high %v74_v32, %v78_v33  ;;  %v2006_v44 = vcombine.low %v74_v32, %v78_v33 }
  0xaa   :  { %v206_v35 = vld [vmem:[%s3073_s1 + $0x5b8] sm:$0xff] }
  0xab   :  { %1784 = vmatpush2.bf16.msra.mxu0 %v2068_v40  ;;  %v2135_v39 = vcombine.high %v202_v34, %v206_v35  ;;  %v66_v40 = vld [vmem:[%s3073_s1 + $0x158] sm:$0xff]  ;;  %v2134_v45 = vcombine.low %v202_v34, %v206_v35 }
  0xac   :  { %1825 = vmatpush2.bf16.msra.mxu1 %v2196_v41  ;;  %1785 = vmatprep.subr.bf16.mxu0 %v2061_v42  ;;  %v70_v41 = vld [vmem:[%s3073_s1 + $0x178] sm:$0xff] }
  0xad   :  { %1826 = vmatprep.subr.bf16.mxu1 %v2189_v43  ;;  %v194_v42 = vld [vmem:[%s3073_s1 + $0x558] sm:$0xff]  ;;  %v1999_v46 = vcombine.high %v66_v40, %v70_v41  ;;  %v1998_v52 = vcombine.low %v66_v40, %v70_v41 }
  0xae   :  { %v198_v43 = vld [vmem:[%s3073_s1 + $0x578] sm:$0xff] }
  0xaf   :  { %1786 = vmatpush2.bf16.msra.mxu0 %v2060_v48  ;;  %v2127_v47 = vcombine.high %v194_v42, %v198_v43  ;;  %v58_v48 = vld [vmem:[%s3073_s1 + $0x118] sm:$0xff]  ;;  %v2126_v53 = vcombine.low %v194_v42, %v198_v43 }
  0xb0   :  { %1827 = vmatpush2.bf16.msra.mxu1 %v2188_v49  ;;  %1787 = vmatprep.subr.bf16.mxu0 %v2053_v50  ;;  %v62_v49 = vld [vmem:[%s3073_s1 + $0x138] sm:$0xff] }
  0xb1   :  { %1828 = vmatprep.subr.bf16.mxu1 %v2181_v51  ;;  %v186_v50 = vld [vmem:[%s3073_s1 + $0x518] sm:$0xff]  ;;  %v1991_v54 = vcombine.high %v58_v48, %v62_v49 }
  0xb2   :  { %v190_v51 = vld [vmem:[%s3073_s1 + $0x538] sm:$0xff] }
  0xb3   :  { %1788 = vmatpush2.bf16.msra.mxu0 %v2052_v56  ;;  %v2119_v55 = vcombine.high %v186_v50, %v190_v51  ;;  %v54_v56 = vld [vmem:[%s3073_s1 + $0xf8] sm:$0xff] }
  0xb4   :  { %1829 = vmatpush2.bf16.msra.mxu1 %v2180_v57  ;;  %1789 = vmatprep.subr.bf16.mxu0 %v2045_v60  ;;  %v182_v57 = vld [vmem:[%s3073_s1 + $0x4f8] sm:$0xff]  ;;  %v1990_v60 = vcombine.low %v58_v48, %v62_v49 }
  0xb5   :  { %1830 = vmatprep.subr.bf16.mxu1 %v2173_v61  ;;  %v2118_v61 = vcombine.low %v186_v50, %v190_v51  ;;  %v26_v17 = vld [vmem:[%s3073_s1 + $0x18] sm:$0xff] }
  0xb6   :  { %v30_v18 = vld [vmem:[%s3073_s1 + $0x38] sm:$0xff] }
  0xb7   :  { %1790 = vmatpush2.bf16.msra.mxu0 %v2044_v2  ;;  %v170_v2 = vld [vmem:[%s3073_s1 + $0x498] sm:$0xff]  ;;  %v1959_v24 = vcombine.high %v26_v17, %v30_v18 }
  0xb8   :  { %1831 = vmatpush2.bf16.msra.mxu1 %v2172_v3  ;;  %1791 = vmatprep.subr.bf16.mxu0 %v2037_v4  ;;  %v174_v3 = vld [vmem:[%s3073_s1 + $0x4b8] sm:$0xff] }
  0xb9   :  { %1832 = vmatprep.subr.bf16.mxu1 %v2165_v5  ;;  %v2103_v7 = vcombine.high %v170_v2, %v174_v3  ;;  %v146_v26 = vld [vmem:[%s3073_s1 + $0x3d8] sm:$0xff] }
  0xba   :  { %v150_v27 = vld [vmem:[%s3073_s1 + $0x3f8] sm:$0xff] }
  0xbb   :  { %1792 = vmatpush2.bf16.msra.mxu0 %v2036_v10  ;;  %v162_v10 = vld [vmem:[%s3073_s1 + $0x458] sm:$0xff]  ;;  %v2079_v32 = vcombine.high %v146_v26, %v150_v27 }
  0xbc   :  { %1833 = vmatpush2.bf16.msra.mxu1 %v2164_v11  ;;  %1793 = vmatprep.subr.bf16.mxu0 %v2029_v12  ;;  %v166_v11 = vld [vmem:[%s3073_s1 + $0x478] sm:$0xff]  ;;  %v1974_v12 = vcombine.low %v42_v0, %v46_v1 }
  0xbd   :  { %1834 = vmatprep.subr.bf16.mxu1 %v2157_v13  ;;  %v2102_v13 = vcombine.low %v170_v2, %v174_v3  ;;  %v2095_v15 = vcombine.high %v162_v10, %v166_v11  ;;  %v138_v34 = vld [vmem:[%s3073_s1 + $0x398] sm:$0xff] }
  0xbe   :  { %v142_v35 = vld [vmem:[%s3073_s1 + $0x3b8] sm:$0xff] }
  0xbf   :  { %1794 = vmatpush2.bf16.msra.mxu0 %v2028_v20  ;;  %v154_v20 = vld [vmem:[%s3073_s1 + $0x418] sm:$0xff]  ;;  %v2071_v40 = vcombine.high %v138_v34, %v142_v35 }
  0xc0   :  { %1835 = vmatpush2.bf16.msra.mxu1 %v2156_v21  ;;  %1795 = vmatprep.subr.bf16.mxu0 %v2021_v22  ;;  %v158_v21 = vld [vmem:[%s3073_s1 + $0x438] sm:$0xff]  ;;  %v1966_v22 = vcombine.low %v34_v8, %v38_v9 }
  0xc1   :  { %1836 = vmatprep.subr.bf16.mxu1 %v2149_v23  ;;  %v2094_v23 = vcombine.low %v162_v10, %v166_v11  ;;  %v2087_v25 = vcombine.high %v154_v20, %v158_v21  ;;  %v130_v42 = vld [vmem:[%s3073_s1 + $0x358] sm:$0xff] }
  0xc2   :  { %v134_v43 = vld [vmem:[%s3073_s1 + $0x378] sm:$0xff] }
  0xc3   :  { %1796 = vmatpush2.bf16.msra.mxu0 %v2020_v28  ;;  %v274_v28 = vld [vmem:[%s3073_s1 + $0x7d8] sm:$0xff]  ;;  %v2063_v48 = vcombine.high %v130_v42, %v134_v43 }
  0xc4   :  { %1837 = vmatpush2.bf16.msra.mxu1 %v2148_v29  ;;  %1847 = vmatprep.subr.bf16.mxu0 %v2015_v30  ;;  %v278_v29 = vld [vmem:[%s3073_s1 + $0x7f8] sm:$0xff]  ;;  %v1958_v30 = vcombine.low %v26_v17, %v30_v18 }
  0xc5   :  { %1888 = vmatprep.subr.bf16.mxu1 %v2143_v31  ;;  %v2086_v31 = vcombine.low %v154_v20, %v158_v21  ;;  %v2207_v33 = vcombine.high %v274_v28, %v278_v29  ;;  %v122_v50 = vld [vmem:[%s3073_s1 + $0x318] sm:$0xff] }
  0xc6   :  { %1798 = vmatmul.mubr.bf16.vlgmr.msra.gmra.mxu0 %v2480_v16  ;;  %v126_v51 = vld [vmem:[%s3073_s1 + $0x338] sm:$0xff] }
  0xc7   :  { %1839 = vmatmul.mubr.bf16.vlgmr.msra.gmra.mxu1 %v2488_v19  ;;  %1848 = vmatpush1.bf16.msra.mxu0 %v2014_v36  ;;  %v266_v36 = vld [vmem:[%s3073_s1 + $0x798] sm:$0xff] }
  0xc8   :  { %1889 = vmatpush1.bf16.msra.mxu1 %v2142_v37  ;;  %1849 = vmatprep.subr.bf16.mxu0 %v2007_v38  ;;  %v270_v37 = vld [vmem:[%s3073_s1 + $0x7b8] sm:$0xff]  ;;  %v2078_v38 = vcombine.low %v146_v26, %v150_v27 }
  0xc9   :  { %1890 = vmatprep.subr.bf16.mxu1 %v2135_v39  ;;  %1879 = vmatprep.mubr.bf16.mxu0 %v2348_v58  ;;  %v50_v58 = vld [vmem:[%s3073_s1 + $0xd8] sm:$0xff]  ;;  %v2206_v39 = vcombine.low %v274_v28, %v278_v29  ;;  %v2199_v41 = vcombine.high %v266_v36, %v270_v37 }
  0xca   :  { %1920 = vmatprep.mubr.bf16.mxu1 %v2350_v59  ;;  %v178_v59 = vld [vmem:[%s3073_s1 + $0x4d8] sm:$0xff]  ;;  %v1983_v62 = vcombine.high %v50_v58, %v54_v56  ;;  %v1982_v4 = vcombine.low %v50_v58, %v54_v56  ;;  %v2055_v58 = vcombine.high %v122_v50, %v126_v51 }
  0xcb   :  { %1850 = vmatpush1.bf16.msra.mxu0 %v2006_v44  ;;  %v2111_v63 = vcombine.high %v178_v59, %v182_v57  ;;  %v2110_v5 = vcombine.low %v178_v59, %v182_v57  ;;  %v258_v44 = vld [vmem:[%s3073_s1 + $0x758] sm:$0xff] }
  0xcc   :  { %1891 = vmatpush1.bf16.msra.mxu1 %v2134_v45  ;;  %1851 = vmatprep.subr.bf16.mxu0 %v1999_v46  ;;  %v262_v45 = vld [vmem:[%s3073_s1 + $0x778] sm:$0xff]  ;;  %v2070_v46 = vcombine.low %v138_v34, %v142_v35 }
  0xcd   :  { %1892 = vmatprep.subr.bf16.mxu1 %v2127_v47  ;;  %v2198_v47 = vcombine.low %v266_v36, %v270_v37  ;;  %v2191_v49 = vcombine.high %v258_v44, %v262_v45  ;;  %v114_v59 = vld [vmem:[%s3073_s1 + $0x2d8] sm:$0xff] }
  0xce   :  { %v118_v57 = vld [vmem:[%s3073_s1 + $0x2f8] sm:$0xff] }
  0xcf   :  { %1852 = vmatpush1.bf16.msra.mxu0 %v1998_v52  ;;  %v250_v52 = vld [vmem:[%s3073_s1 + $0x718] sm:$0xff]  ;;  %v2047_v0 = vcombine.high %v114_v59, %v118_v57 }
  0xd0   :  { %1893 = vmatpush1.bf16.msra.mxu1 %v2126_v53  ;;  %1853 = vmatprep.subr.bf16.mxu0 %v1991_v54  ;;  %v254_v53 = vld [vmem:[%s3073_s1 + $0x738] sm:$0xff]  ;;  %v2062_v54 = vcombine.low %v130_v42, %v134_v43 }
  0xd1   :  { %1894 = vmatprep.subr.bf16.mxu1 %v2119_v55  ;;  %v2190_v55 = vcombine.low %v258_v44, %v262_v45  ;;  %v2183_v56 = vcombine.high %v250_v52, %v254_v53  ;;  %v106_v2 = vld [vmem:[%s3073_s1 + $0x298] sm:$0xff] }
  0xd2   :  { %v110_v3 = vld [vmem:[%s3073_s1 + $0x2b8] sm:$0xff] }
  0xd3   :  { %1854 = vmatpush1.bf16.msra.mxu0 %v1990_v60  ;;  %v242_v60 = vld [vmem:[%s3073_s1 + $0x6d8] sm:$0xff]  ;;  %v2039_v8 = vcombine.high %v106_v2, %v110_v3 }
  0xd4   :  { %1895 = vmatpush1.bf16.msra.mxu1 %v2118_v61  ;;  %1855 = vmatprep.subr.bf16.mxu0 %v1983_v62  ;;  %v246_v61 = vld [vmem:[%s3073_s1 + $0x6f8] sm:$0xff]  ;;  %v2054_v62 = vcombine.low %v122_v50, %v126_v51 }
  0xd5   :  { %1896 = vmatprep.subr.bf16.mxu1 %v2111_v63  ;;  %v2182_v63 = vcombine.low %v250_v52, %v254_v53  ;;  %v2175_v1 = vcombine.high %v242_v60, %v246_v61  ;;  %v98_v10 = vld [vmem:[%s3073_s1 + $0x258] sm:$0xff] }
  0xd6   :  { %v102_v11 = vld [vmem:[%s3073_s1 + $0x278] sm:$0xff] }
  0xd7   :  { %1856 = vmatpush1.bf16.msra.mxu0 %v1982_v4  ;;  %v234_v4 = vld [vmem:[%s3073_s1 + $0x698] sm:$0xff]  ;;  %v2031_v18 = vcombine.high %v98_v10, %v102_v11 }
  0xd8   :  { %1897 = vmatpush1.bf16.msra.mxu1 %v2110_v5  ;;  %1857 = vmatprep.subr.bf16.mxu0 %v1975_v6  ;;  %v238_v5 = vld [vmem:[%s3073_s1 + $0x6b8] sm:$0xff]  ;;  %v2046_v6 = vcombine.low %v114_v59, %v118_v57 }
  0xd9   :  { %1898 = vmatprep.subr.bf16.mxu1 %v2103_v7  ;;  %v2174_v7 = vcombine.low %v242_v60, %v246_v61  ;;  %v2167_v9 = vcombine.high %v234_v4, %v238_v5  ;;  %v2166_v17 = vcombine.low %v234_v4, %v238_v5  ;;  %v90_v21 = vld [vmem:[%s3073_s1 + $0x218] sm:$0xff] }
  0xdb   :  { %1858 = vmatpush1.bf16.msra.mxu0 %v1974_v12  ;;  %v226_v12 = vld [vmem:[%s3073_s1 + $0x658] sm:$0xff] }
  0xdc   :  { %1899 = vmatpush1.bf16.msra.mxu1 %v2102_v13  ;;  %1859 = vmatprep.subr.bf16.mxu0 %v1967_v14  ;;  %v230_v13 = vld [vmem:[%s3073_s1 + $0x678] sm:$0xff]  ;;  %v2038_v14 = vcombine.low %v106_v2, %v110_v3 }
  0xdd   :  { %1900 = vmatprep.subr.bf16.mxu1 %v2095_v15  ;;  %v281_v15 = vlaneseq  ;;  %v2159_v20 = vcombine.high %v226_v12, %v230_v13  ;;  %v2158_v27 = vcombine.low %v226_v12, %v230_v13 }
  0xdf   :  { %1860 = vmatpush1.bf16.msra.mxu0 %v1966_v22  ;;  %v94_v22 = vld [vmem:[%s3073_s1 + $0x238] sm:$0xff]  ;;  %v3054_v26 = vshrl.u32 %v281_v15, 7 }
  0xe0   :  { %1901 = vmatpush1.bf16.msra.mxu1 %v2094_v23  ;;  %1861 = vmatprep.subr.bf16.mxu0 %v1959_v24  ;;  %v218_v23 = vld [vmem:[%s3073_s1 + $0x618] sm:$0xff]  ;;  %v2023_v28 = vcombine.high %v90_v21, %v94_v22 }
  0xe1   :  { %1902 = vmatprep.subr.bf16.mxu1 %v2087_v25  ;;  %v222_v24 = vld [vmem:[%s3073_s1 + $0x638] sm:$0xff]  ;;  %v2030_v25 = vcombine.low %v98_v10, %v102_v11  ;;  %v287_v34 = vsub.s32 1, %v3054_v26  ;;  %v295_v50 = vsub.s32 3, %v3054_v26  ;;  %v307_v15 = vsub.s32 6, %v3054_v26  ;;  %s2231_s1 = smov [#allocation2]  }
  0xe2   :  { %v2151_v29 = vcombine.high %v218_v23, %v222_v24 }
  0xe3   :  { %1862 = vmatpush1.bf16.msra.mxu0 %v1958_v30  ;;  %v2022_v30 = vcombine.low %v90_v21, %v94_v22 }
  0xe4   :  { %1903 = vmatpush1.bf16.msra.mxu1 %v2086_v31  ;;  %1863 = vmatprep.subr.bf16.mxu0 %v2079_v32  ;;  %v283_v31 = vsub.s32 0, %v3054_v26  ;;  %v2150_v32 = vcombine.low %v218_v23, %v222_v24 }
  0xe5   :  { %1904 = vmatprep.subr.bf16.mxu1 %v2207_v33  ;;  %v279_v33 = vld [vmem:[%s3074_s2] sm:$0xff]  ;;  %s1944_s2 = sshll.u32 %s2231_s1, 4  ;;  %s1945_s2 = int_to_ptr.vmem [resolvable:$true] %s1944_s2 }
  0xe6   :  { %v284_v35 = vrot.slane %v279_v33, %v283_v31  ;;  %v288_v36 = vrot.slane %v279_v33, %v287_v34  ;;  %v296_v51 = vrot.slane %v279_v33, %v295_v50  ;;  %s2209_s7 = scalar_lea.vmem %s1945_s2, 1024  ;;  %p2214_p1 = scmp.lt.s32.totalorder %s1945_s2, %s1945_s2 }
  0xe7   :  { %1864 = vmatpush2.bf16.msra.mxu0 %v2078_v38  ;;  %p2210_p0 = scmp.ne.s32.totalorder %s1945_s2, %s2209_s7  ;;  %p2215_p2 = scmp.lt.s32.totalorder %s2209_s7, %s2209_s7 }
  0xe8   :  { %1905 = vmatpush2.bf16.msra.mxu1 %v2206_v39  ;;  %1865 = vmatprep.subr.bf16.mxu0 %v2071_v40 }
  0xe9   :  { %1906 = vmatprep.subr.bf16.mxu1 %v2199_v41  ;;  %p2216_p3 = por %p2215_p2, %p2214_p1 }
  0xeb   :  { %1866 = vmatpush2.bf16.msra.mxu0 %v2070_v46  ;;  %p2217_p4 = pnand %p2216_p3, %p2210_p0 }
  0xec   :  { %1907 = vmatpush2.bf16.msra.mxu1 %v2198_v47  ;;  %1867 = vmatprep.subr.bf16.mxu0 %v2063_v48 }
  0xed   :  { %1908 = vmatprep.subr.bf16.mxu1 %v2191_v49  ;;  %v291_v49 = vsub.s32 2, %v3054_v26 }
  0xef   :  { %1868 = vmatpush2.bf16.msra.mxu0 %v2062_v54 }
  0xf0   :  { %1909 = vmatpush2.bf16.msra.mxu1 %v2190_v55  ;;  %1869 = vmatprep.subr.bf16.mxu0 %v2055_v58 }
  0xf1   :  { %1910 = vmatprep.subr.bf16.mxu1 %v2183_v56 }
  0xf3   :  { %1870 = vmatpush2.bf16.msra.mxu0 %v2054_v62 }
  0xf4   :  { %1911 = vmatpush2.bf16.msra.mxu1 %v2182_v63  ;;  %1871 = vmatprep.subr.bf16.mxu0 %v2047_v0  ;;  %v299_v63 = vsub.s32 4, %v3054_v26  ;;  %v303_v0 = vsub.s32 5, %v3054_v26 }
  0xf5   :  { %1912 = vmatprep.subr.bf16.mxu1 %v2175_v1 }
  0xf6   :  { %v300_v1 = vrot.slane %v279_v33, %v299_v63  ;;  %v304_v2 = vrot.slane %v279_v33, %v303_v0 }
  0xf7   :  { %1872 = vmatpush2.bf16.msra.mxu0 %v2046_v6 }
  0xf8   :  { %1913 = vmatpush2.bf16.msra.mxu1 %v2174_v7  ;;  %1873 = vmatprep.subr.bf16.mxu0 %v2039_v8 }
  0xf9   :  { %1914 = vmatprep.subr.bf16.mxu1 %v2167_v9 }
  0xfb   :  { %1874 = vmatpush2.bf16.msra.mxu0 %v2038_v14 }
  0xfc   :  { %1915 = vmatpush2.bf16.msra.mxu1 %v2166_v17  ;;  %1875 = vmatprep.subr.bf16.mxu0 %v2031_v18  ;;  %v311_v17 = vsub.s32 7, %v3054_v26  ;;  %v308_v18 = vrot.slane %v279_v33, %v307_v15 }
  0xfd   :  { %1916 = vmatprep.subr.bf16.mxu1 %v2159_v20 }
  0xfe   :  { %v312_v20 = vrot.slane %v279_v33, %v311_v17 }
  0xff   :  { %1876 = vmatpush2.bf16.msra.mxu0 %v2030_v25 }
 0x100   :  { %1917 = vmatpush2.bf16.msra.mxu1 %v2158_v27  ;;  %1877 = vmatprep.subr.bf16.mxu0 %v2023_v28 }
 0x101   :  { %1918 = vmatprep.subr.bf16.mxu1 %v2151_v29 }
 0x103   :  { %1878 = vmatpush2.bf16.msra.mxu0 %v2022_v30 }
 0x104   :  { %1919 = vmatpush2.bf16.msra.mxu1 %v2150_v32 }
 0x106   :  { %v1635_v37 = vpop.f32.mrf.mxu0  ;;  %1880 = vmatmul.mubr.bf16.vlgmr.msra.gmra.mxu0 %v2480_v16  ;;  %v292_v16 = vrot.slane %v279_v33, %v291_v49 }
 0x107   :  { %v1636_v38 = vadd.f32 %v1635_v37, %v284_v35  ;;  %v1676_v39 = vpop.f32.mrf.mxu1  ;;  %1921 = vmatmul.mubr.bf16.vlgmr.msra.gmra.mxu1 %v2488_v19 }
 0x108   :  { %v1637_v40 = vpop.f32.mrf.mxu0 }
 0x109   :  { %v1677_v41 = vadd.f32 %v1676_v39, %v1636_v38  ;;  %v1638_v42 = vadd.f32 %v1637_v40, %v288_v36  ;;  %v1678_v43 = vpop.f32.mrf.mxu1 }
 0x10a   :  { %v1639_v44 = vpop.f32.mrf.mxu0 }
 0x10b   :  { %1929 = vst [vmem:[#allocation2] sm:$0xff] %v1677_v41  ;;  %v1679_v45 = vadd.f32 %v1678_v43, %v1638_v42  ;;  %v1680_v46 = vpop.f32.mrf.mxu1 }
 0x10c   :  { %v1640_v47 = vpop.f32.mrf.mxu0 }
 0x10d   :  { %1930 = vst [vmem:[#allocation2 + $0x8] sm:$0xff] %v1679_v45  ;;  %v1681_v48 = vpop.f32.mrf.mxu1 }
 0x146   :  { %v1717_v52 = vpop.f32.mrf.mxu0 }
 0x147   :  { %v1718_v53 = vadd.f32 %v1717_v52, %v292_v16  ;;  %v1758_v19 = vpop.f32.mrf.mxu1 }
 0x148   :  { %v1719_v54 = vpop.f32.mrf.mxu0 }
 0x149   :  { %v1759_v55 = vadd.f32 %v1758_v19, %v1718_v53  ;;  %v1720_v58 = vadd.f32 %v1719_v54, %v296_v51  ;;  %v1760_v56 = vpop.f32.mrf.mxu1 }
 0x14a   :  { %v1721_v59 = vpop.f32.mrf.mxu0 }
 0x14b   :  { %1931 = vst [vmem:[#allocation2 + $0x10] sm:$0xff] %v1759_v55  ;;  %v1761_v57 = vadd.f32 %v1760_v56, %v1720_v58  ;;  %v1762_v60 = vpop.f32.mrf.mxu1 }
 0x14c   :  { %v1722_v61 = vpop.f32.mrf.mxu0 }
 0x14d   :  { %1932 = vst [vmem:[#allocation2 + $0x18] sm:$0xff] %v1761_v57  ;;  %v1763_v62 = vpop.f32.mrf.mxu1 }
 0x186   :  { %v1799_v3 = vpop.f32.mrf.mxu0 }
 0x187   :  { %v1800_v4 = vadd.f32 %v1799_v3, %v300_v1  ;;  %v1840_v5 = vpop.f32.mrf.mxu1 }
 0x188   :  { %v1801_v6 = vpop.f32.mrf.mxu0 }
 0x189   :  { %v1841_v7 = vadd.f32 %v1840_v5, %v1800_v4  ;;  %v1802_v8 = vadd.f32 %v1801_v6, %v304_v2  ;;  %v1842_v9 = vpop.f32.mrf.mxu1 }
 0x18a   :  { %v1803_v10 = vpop.f32.mrf.mxu0 }
 0x18b   :  { %1933 = vst [vmem:[#allocation2 + $0x20] sm:$0xff] %v1841_v7  ;;  %v1843_v11 = vadd.f32 %v1842_v9, %v1802_v8  ;;  %v1844_v12 = vpop.f32.mrf.mxu1 }
 0x18c   :  { %v1804_v13 = vpop.f32.mrf.mxu0 }
 0x18d   :  { %1934 = vst [vmem:[#allocation2 + $0x28] sm:$0xff] %v1843_v11  ;;  %v1845_v14 = vpop.f32.mrf.mxu1 }
 0x1c6   :  { %v1881_v21 = vpop.f32.mrf.mxu0 }
 0x1c7   :  { %v1882_v22 = vadd.f32 %v1881_v21, %v308_v18  ;;  %v1922_v23 = vpop.f32.mrf.mxu1 }
 0x1c8   :  { %v1883_v24 = vpop.f32.mrf.mxu0 }
 0x1c9   :  { %v1923_v25 = vadd.f32 %v1922_v23, %v1882_v22  ;;  %v1884_v27 = vadd.f32 %v1883_v24, %v312_v20  ;;  %v1924_v28 = vpop.f32.mrf.mxu1 }
 0x1ca   :  { %v1885_v29 = vpop.f32.mrf.mxu0 }
 0x1cb   :  { %1935 = vst [vmem:[#allocation2 + $0x30] sm:$0xff] %v1923_v25  ;;  %v1925_v30 = vadd.f32 %v1924_v28, %v1884_v27  ;;  %v1926_v31 = vpop.f32.mrf.mxu1 }
 0x1cc   :  { %v1886_v32 = vpop.f32.mrf.mxu0 }
 0x1cd   :  { %1937 = vst.msk [vmem:[#allocation2 + $0x38] sm:$0xff] %vm1936_vm0, %v1925_v30  ;;  %v1927_v26 = vpop.f32.mrf.mxu1 }
 0x1ce   :  { %2220 = shalt.err (!%p2217_p4)
}
 0x1cf   :  { %1947 = dma.vmem_to_hbm [thread:$0]  %s1945_s2, 1024, %s3075_s3, [#allocation3]  }
 0x1d0   :  { %2229 = dma.done.wait [#allocation3], 1024  }
 0x1d1   :  { %2230 = vsyncadd [#allocation3], 4294966272 }
 0x1d2   :  { %1951 = vsyncpa [#allocation3], 1 }

</bundles_post_ra>
